<compile_context>
chip_gen: v7x
topology: tpu7x:2x2x1
jax: 0.10.0
libtpu: 0.0.40
codegen_flags: <defaults>
</compile_context>

<pallas_src>
import math
import functools

import jax
import jax.numpy as jnp
from jax.experimental import pallas as pl
from jax.experimental.pallas import tpu as pltpu

_LANE = 128
_SUBLANE = 8
_PALLAS_MIN_ELEMENTS = 1 << 20   # below ~1M elements, let XLA fuse the add


def _chip_tuning():
    """Best-effort per-generation tuning: (tile_bytes, vmem_limit_bytes, min_grid_steps).

    v7x:  64 MiB VMEM, ~3.2 TB/s HBM, 2 TCs  -> 8 MiB tiles, 48 MiB limit, >=2 grid steps.
    v6e: 128 MiB VMEM, ~1.4 TB/s HBM, 1 TC   -> 4 MiB tiles, 48 MiB limit.
    v5e: 128 MiB VMEM, ~0.82 TB/s HBM, 1 TC  -> 2 MiB tiles, 32 MiB limit (already amortized).
    """
    kind = ""
    try:
        kind = jax.devices()[0].device_kind.lower()
    except Exception:
        pass
    vmem_cap = None
    try:
        vmem_cap = pltpu.get_tpu_info().vmem_capacity_bytes
    except Exception:
        pass

    if "v5e" in kind or "v5 lite" in kind or "v5lite" in kind:
        return 2 * 1024 * 1024, 32 * 1024 * 1024, 1
    if (vmem_cap is not None and vmem_cap <= 64 * 1024 * 1024) or "v7" in kind or "7x" in kind:
        # v7x: 2 double-buffered 8 MiB tiles (x + out) = 32 MiB + pe, well under 64 MiB.
        return 8 * 1024 * 1024, 48 * 1024 * 1024, 2
    # v6e (or unknown): ample VMEM headroom, moderate bandwidth.
    return 4 * 1024 * 1024, 48 * 1024 * 1024, 1


_TILE_BYTES, _VMEM_LIMIT_BYTES, _MIN_GRID_STEPS = _chip_tuning()


def make_positional_encoding(d_model: int, max_len: int = 5000, dtype=jnp.float32):
    """Builds the (max_len, d_model) sin/cos table exactly like the torch __init__.

    For bf16 serving, pass dtype=jnp.bfloat16 (halves HBM bytes for pe)."""
    position = jnp.arange(0, max_len, dtype=jnp.float32)[:, None]            # (max_len, 1)
    div_term = jnp.exp(
        jnp.arange(0, d_model, 2, dtype=jnp.float32) * -(math.log(10000.0) / d_model)
    )                                                                         # (d_model//2,)
    pe = jnp.zeros((max_len, d_model), dtype=jnp.float32)
    pe = pe.at[:, 0::2].set(jnp.sin(position * div_term))
    pe = pe.at[:, 1::2].set(jnp.cos(position * div_term))
    return pe.astype(dtype)


def _pe_add_kernel(x_ref, pe_ref, o_ref):
    # x_ref/o_ref: (tile_b, tile_n); pe_ref: (1, tile_n) broadcast over rows.
    o_ref[...] = (x_ref[...] + pe_ref[...]).astype(o_ref.dtype)


def _select_tiles(B, N, itemsize):
    """Pick (tile_b, tile_n) for the flattened (B, N=S*D) view."""
    # dtype-aware sublane pack: 8 rows f32, 16 bf16, 32 int8/fp8.
    sublane = _SUBLANE * max(1, 4 // itemsize)
    target_elems = max(_LANE, _TILE_BYTES // itemsize)

    if N >= target_elems:
        # Large flattened feature: one sublane group of batch rows, lane-tile to budget.
        tile_b = B if B <= sublane else sublane
        lane_budget = max(_LANE, target_elems // tile_b)
        tile_n = min(N, (lane_budget // _LANE) * _LANE)     # lane-dense multiple of 128
    else:
        # Small flattened feature: take all of it and pack batch rows to the byte
        # budget (rounded to the sublane pack) so tiles stay ~_TILE_BYTES instead
        # of collapsing to a few hundred KiB for large-B / small-N shapes.
        tile_n = N
        rows = max(1, target_elems // N)
        if rows >= B:
            tile_b = B
        else:
            tile_b = min(B, max(sublane, (rows // sublane) * sublane))

    # v7x has 2 TensorCores: make sure the 'parallel' grid has >= 2 steps so the
    # second core gets work.  Prefer splitting the inner batch axis (pe tile stays
    # resident); otherwise split the lane axis.
    if _MIN_GRID_STEPS > 1 and pl.cdiv(N, tile_n) * pl.cdiv(B, tile_b) < _MIN_GRID_STEPS:
        if B >= 2 * sublane:
            tile_b = max(sublane, ((B // 2) // sublane) * sublane)
        elif N >= 2 * _LANE:
            tile_n = max(_LANE, ((N // 2) // _LANE) * _LANE)
        # else: too small to split profitably; a single step is fine.

    return tile_b, tile_n


@functools.partial(jax.jit, static_argnames=("force_pallas",))
def positional_encoding_forward(x, pe, *, force_pallas=False):
    """x: (B, S, D); pe: (max_len, D).  Returns x + pe[:S] (dropout = identity)."""
    B, S, D = x.shape
    max_len, pe_d = pe.shape
    assert pe_d == D, "pe feature dim must match x"
    assert S <= max_len, "sequence length exceeds positional-encoding max_len"

    # Keep the VPU add in-dtype and halve pe DMA bytes in bf16 serving.
    pe = pe.astype(x.dtype)

    if not force_pallas and B * S * D < _PALLAS_MIN_ELEMENTS:
        # Small problem: a standalone broadcast add is at HBM roofline under XLA
        # and fuses with neighboring ops; the pallas_call would only block that.
        pe_slab = jax.lax.slice(pe, (0, 0), (S, D))
        return (x + pe_slab[None, :, :]).astype(x.dtype)

    N = S * D
    itemsize = jnp.dtype(x.dtype).itemsize
    tile_b, tile_n = _select_tiles(B, N, itemsize)

    # --- layout plumbing (free bitcast reshapes, no data movement) -----------
    x2 = x.reshape(B, N)
    if tile_n % _LANE == 0:
        # Flattened full pe table: the first S*D entries are exactly pe[:S] in
        # row-major order, so the lane-tile index from x2 addresses it directly.
        pe_in = pe.reshape(1, max_len * D)
    else:
        # tile_n == N (full dim) but not 128-aligned: static slice so the pe
        # block's last dim equals its full array dim (legal block shape).
        pe_in = jax.lax.slice(pe, (0, 0), (S, D)).reshape(1, N)

    # b innermost -> pe tile index invariant across it (not re-DMA'd per batch tile).
    grid = (pl.cdiv(N, tile_n), pl.cdiv(B, tile_b))

    out2 = pl.pallas_call(
        _pe_add_kernel,
        out_shape=jax.ShapeDtypeStruct((B, N), x.dtype),
        grid_spec=pltpu.PrefetchScalarGridSpec(
            num_scalar_prefetch=0,
            grid=grid,
            in_specs=[
                pl.BlockSpec((tile_b, tile_n), lambda n, b: (b, n)),  # x rows
                pl.BlockSpec((1, tile_n), lambda n, b: (0, n)),       # pe slab (reused over b)
            ],
            out_specs=pl.BlockSpec((tile_b, tile_n), lambda n, b: (b, n)),
        ),
        compiler_params=pltpu.CompilerParams(
            dimension_semantics=("parallel", "parallel"),
            vmem_limit_bytes=_VMEM_LIMIT_BYTES,
        ),
    )(x2, pe_in)
    return out2.reshape(B, S, D)


if __name__ == "__main__":
    key = jax.random.PRNGKey(0)

    # --- demo shapes consistent with the module: batch=2, seq=8, d_model=32
    B, S, D = 2, 8, 32
    MAX_LEN = 64
    DROPOUT_P = 0.1  # unused at serving time (eval-mode identity)

    x = jax.random.normal(key, (B, S, D), dtype=jnp.float32)
    pe = make_positional_encoding(D, max_len=MAX_LEN, dtype=jnp.float32)

    out = positional_encoding_forward(x, pe, force_pallas=True)  # force kernel path
    out = jax.block_until_ready(out)
    ref = x + pe[:S][None, :, :]
    assert out.shape == (B, S, D)
    assert jnp.allclose(out, ref, atol=1e-6, rtol=1e-6)

    # --- second check: exercises the tile_b packing path / multi-step grid
    k1, k2 = jax.random.split(key)
    B2, S2, D2 = 16, 64, 128
    x2 = jax.random.normal(k1, (B2, S2, D2), dtype=jnp.float32)
    pe2 = make_positional_encoding(D2, max_len=128, dtype=jnp.float32)
    out2 = jax.block_until_ready(positional_encoding_forward(x2, pe2, force_pallas=True))
    assert jnp.allclose(out2, x2 + pe2[:S2][None, :, :], atol=1e-6, rtol=1e-6)

    # --- third check: ragged shapes (partial-tile masking) + bf16 (dtype-aware sublane)
    B3, S3, D3 = 5, 10, 96
    x3 = jax.random.normal(k2, (B3, S3, D3), dtype=jnp.bfloat16)
    pe3 = make_positional_encoding(D3, max_len=32, dtype=jnp.bfloat16)
    out3 = jax.block_until_ready(positional_encoding_forward(x3, pe3, force_pallas=True))
    ref3 = x3 + pe3[:S3][None, :, :]
    assert jnp.allclose(out3.astype(jnp.float32), ref3.astype(jnp.float32), atol=1e-2, rtol=1e-2)

    print("KERNEL_OK")
</pallas_src>

<mosaic_0001>
module attributes {stable_mosaic.version = 11 : i64} {
  func.func @_pe_add_kernel(%arg0: i32, %arg1: i32, %arg2: memref<2x256xf32, #tpu.memory_space<vmem>>, %arg3: memref<1x256xf32, #tpu.memory_space<vmem>>, %arg4: memref<2x256xf32, #tpu.memory_space<vmem>>) attributes {dimension_semantics = [#tpu.dimension_semantics<parallel>, #tpu.dimension_semantics<parallel>], iteration_bounds = array<i64: 1, 1>, scalar_prefetch = 0 : i64, scratch_operands = 0 : i64, tpu.core_type = #tpu.core_type<tc>, window_params = [{transform_indices = @transform_0, window_bounds = array<i64: 2, 256>}, {transform_indices = @transform_1, window_bounds = array<i64: 1, 256>}, {transform_indices = @transform_2, window_bounds = array<i64: 2, 256>}]} {
    %c0 = arith.constant 0 : index
    %c0_0 = arith.constant 0 : index
    %0 = vector.load %arg2[%c0, %c0_0] : memref<2x256xf32, #tpu.memory_space<vmem>>, vector<2x256xf32>
    %c0_1 = arith.constant 0 : index
    %c0_2 = arith.constant 0 : index
    %1 = vector.load %arg3[%c0_1, %c0_2] : memref<1x256xf32, #tpu.memory_space<vmem>>, vector<1x256xf32>
    %2 = vector.broadcast %1 : vector<1x256xf32> to vector<2x256xf32>
    %3 = arith.addf %0, %2 : vector<2x256xf32>
    %c0_3 = arith.constant 0 : index
    %c0_4 = arith.constant 0 : index
    %4 = vector.load %arg4[%c0_3, %c0_4] : memref<2x256xf32, #tpu.memory_space<vmem>>, vector<2x256xf32>
    tpu.vector_store %arg4[%c0_3, %c0_4], %3 {strides = array<i32>} : memref<2x256xf32, #tpu.memory_space<vmem>>, vector<2x256xf32>,
    return
  }
  func.func @transform_0(%arg0: i32, %arg1: i32) -> (i32, i32) {
    %c0_i32 = arith.constant 0 : i32
    return %arg1, %arg0 : i32, i32
  }
  func.func @transform_1(%arg0: i32, %arg1: i32) -> (i32, i32) {
    %c0_i32 = arith.constant 0 : i32
    %c0_i32_0 = arith.constant 0 : i32
    return %c0_i32, %arg0 : i32, i32
  }
  func.func @transform_2(%arg0: i32, %arg1: i32) -> (i32, i32) {
    %c0_i32 = arith.constant 0 : i32
    return %arg1, %arg0 : i32, i32
  }
}

</mosaic_0001>

<bundles_post_ra>
// kernel: positional_encoding_forward.1
= control target key start
LH: loop header
LB: loop body
LE: loop exit
PB: predicated region body
PF: predicated region fallthrough
CT: control target
= control target key end

     0   :  { %v14_v0 = vlaneseq  ;;  %v38_v1 = vmov 1983009808   ;;  %s63_s1 = inlined_call_operand.vmem [shape: f32[1,2048], index: 1, kind: input, shape index: {}]   ;;  %s64_s0 = inlined_call_operand.vmem [shape: f32[2,256], index: 0, kind: input, shape index: {}]   ;;  %s65_s2 = inlined_call_operand.vmem [shape: f32[2,256], index: 2, kind: output, shape index: {}]  }
   0x1   :  { %v24_v2 = vunpack.c.l.s4 %v38_v1  ;;  %v12_v4 = vld [vmem:[%s63_s1] sm:$0x3] }
   0x2   :  { %v15_v3 = vshrl.u32 %v14_v0, 7  ;;  %v11_v12 = vld [vmem:[%s64_s0] sm:$0xf] }
   0x3   :  { %v25_v5 = vunpack.c.0.s8 %v24_v2 }
   0x4   :  { %v16_v6 = vsub.s32 0, %v15_v3  ;;  %v20_v7 = vsub.s32 1, %v15_v3 }
   0x5   :  { %v28_v10 = vsub.s32 %v25_v5, %v15_v3 }
   0x6   :  { %v17_v8 = vrot.slane %v12_v4, %v16_v6  ;;  %v21_v9 = vrot.slane %v12_v4, %v20_v7 }
   0x8   :  { %v22_v11 = vcombine.low %v17_v8, %v21_v9 }
   0xa   :  { %v29_v13 = vrot.slane %v22_v11, %v28_v10 }
   0xc   :  { %v31_v14 = vadd.f32 %v29_v13, %v11_v12 }
   0xe   :  { %32 = vst [vmem:[%s65_s2] sm:$0xf] %v31_v14 }

</bundles_post_ra>
